<compile_context>
chip_gen: v5e
topology: v5e:2x2
jax: 0.10.0
libtpu: 0.0.40
codegen_flags: <defaults>
</compile_context>

<pallas_src>
import jax
import jax.numpy as jnp
from jax.experimental import pallas as pl
from jax.experimental.pallas import tpu as pltpu

_MAX_TILE_BYTES = 8 * 1024 * 1024      # hard cap on a single per-buffer tile


def _vmem_budget():
    """Generation-aware (vmem_limit_bytes, per-buffer tile byte budget)."""
    try:
        vmem_cap = int(pltpu.get_tpu_info().vmem_capacity_bytes)
    except Exception:  # no TPU info available: assume the smallest (v7x, 64 MiB)
        vmem_cap = 64 * 1024 * 1024
    vmem_limit = min(64 * 1024 * 1024, (vmem_cap * 3) // 4)   # 64M v5e/v6e, 48M v7x
    # 2 streamed arrays (x, out) x 2 pipeline buffers each, plus headroom for
    # the small scale/bias blocks.
    tile_budget = min(_MAX_TILE_BYTES, vmem_limit // 6)
    return vmem_limit, tile_budget


def _choose_tiles(n_rows, n_lanes, itemsize, budget):
    """Pick (row_tile, lane_tile) for a (n_rows, n_lanes) streamed array.

    Lane axis first: full row if it fits, otherwise the largest 128-multiple
    divisor of n_lanes inside the budget (identical, unmasked DMA/vst for every
    block); then as many rows (multiple of 8, or all of them) as fit.
    """
    min_rows = n_rows if n_rows < 8 else 8
    lane_budget = max(128, budget // (min_rows * itemsize))
    if n_lanes <= lane_budget:
        tl = n_lanes
    else:
        max_lanes = max(128, (lane_budget // 128) * 128)
        tl = None
        for cand in range(max_lanes, 127, -128):       # prefer an exact divisor
            if n_lanes % cand == 0:
                tl = cand
                break
        if tl is None:
            tl = max_lanes
    rows_fit = max(min_rows, budget // (tl * itemsize))
    tr = n_rows if n_rows <= rows_fit else max(8, (rows_fit // 8) * 8)
    return tr, tl


def _normalize_kernel(scale_ref, bias_ref, x_ref, o_ref):
    # scale/bias blocks are either (TR, 1) per-row or (1, TL) per-lane f32
    # constants; either way this is one broadcasted fused multiply-add (VPU).
    x = x_ref[...].astype(jnp.float32)
    o_ref[...] = (x * scale_ref[...] + bias_ref[...]).astype(o_ref.dtype)


def normalizer_forward(x, mean, std):
    """(x - mean[None,:,None,None]) / std[None,:,None,None] for NCHW `x`."""
    N, C, H, W = x.shape
    out_dtype = x.dtype if jnp.issubdtype(x.dtype, jnp.floating) else jnp.float32

    # Fold (mean, std) into f32 scale/bias: y = x * (1/std) + (-mean/std).
    scale = 1.0 / std.astype(jnp.float32)                    # (C,)
    bias = -mean.astype(jnp.float32) * scale                 # (C,)

    itemsize = jnp.dtype(x.dtype).itemsize
    vmem_limit, tile_budget = _vmem_budget()

    # Shape-conditional flattening (both views are pure reshapes of NCHW):
    #   lane mode: (N, C*H*W) rows with per-lane scale/bias vectors — used when
    #     H*W is too narrow for dense lanes or there are only a few (n, c) rows.
    #   row mode:  (N*C, H*W) rows with per-row scalar scale/bias.
    lane_mode = (H * W < 128) or (N * C < 32)
    if lane_mode:
        R, L = N, C * H * W
        scale_arr = jnp.repeat(scale, H * W).reshape(1, L)   # (1, C*H*W)
        bias_arr = jnp.repeat(bias, H * W).reshape(1, L)
    else:
        R, L = N * C, H * W
        scale_arr = jnp.tile(scale, N).reshape(R, 1)         # (N*C, 1)
        bias_arr = jnp.tile(bias, N).reshape(R, 1)
    x2 = x.reshape(R, L)

    tr, tl = _choose_tiles(R, L, itemsize, tile_budget)

    # v7x has 2 TensorCores per chip: if everything fits in one block, split it
    # so megacore sharding gets >=2 "parallel" blocks (harmless elsewhere).
    if pl.cdiv(R, tr) * pl.cdiv(L, tl) == 1:
        if R >= 16:
            tr = max(8, ((pl.cdiv(R, 2) + 7) // 8) * 8)
        elif L >= 256:
            tl = max(128, ((L // 2) // 128) * 128)

    grid = (pl.cdiv(R, tr), pl.cdiv(L, tl))

    if lane_mode:
        # Per-lane constants follow the lane-tile index (resident when grid j==1).
        const_spec = pl.BlockSpec((1, tl), lambda i, j: (0, j))
    else:
        # Per-row constants follow the row band; re-fetched only when the outer
        # row index changes, i.e. one tiny DMA per row band.
        const_spec = pl.BlockSpec((tr, 1), lambda i, j: (i, 0))

    cost = pl.CostEstimate(
        flops=2 * x.size,
        transcendentals=0,
        bytes_accessed=x.size * itemsize
        + x.size * jnp.dtype(out_dtype).itemsize
        + 2 * scale_arr.size * 4,
    )

    out2 = pl.pallas_call(
        _normalize_kernel,
        out_shape=jax.ShapeDtypeStruct((R, L), out_dtype),
        grid_spec=pltpu.PrefetchScalarGridSpec(
            num_scalar_prefetch=0,
            grid=grid,
            in_specs=[
                const_spec,                                    # scale (f32)
                const_spec,                                    # bias  (f32)
                pl.BlockSpec((tr, tl), lambda i, j: (i, j)),   # x
            ],
            out_specs=pl.BlockSpec((tr, tl), lambda i, j: (i, j)),
        ),
        compiler_params=pltpu.CompilerParams(
            dimension_semantics=("parallel", "parallel"),
            vmem_limit_bytes=vmem_limit,
        ),
        cost_estimate=cost,
    )(scale_arr, bias_arr, x2)

    return out2.reshape(N, C, H, W)


if __name__ == "__main__":
    key = jax.random.PRNGKey(0)

    # Small NCHW input consistent with Normalizer: batch=2, channels=4, 16x16.
    N, C, H, W = 2, 4, 16, 16
    x = jax.random.normal(key, (N, C, H, W), dtype=jnp.float32)

    # Deterministic per-channel buffers (as registered in Normalizer.__init__).
    mean = jnp.array([0.485, 0.456, 0.406, 0.5], dtype=jnp.float32)
    std = jnp.array([0.229, 0.224, 0.225, 0.25], dtype=jnp.float32)

    out = jax.block_until_ready(normalizer_forward(x, mean, std))

    # Pure-JAX reference (same math as normalize_fn).
    ref = (x - mean[None, :, None, None]) / std[None, :, None, None]
    assert out.shape == x.shape
    assert out.dtype == ref.dtype
    assert jnp.allclose(out, ref, atol=1e-5, rtol=1e-5)

    print("KERNEL_OK")
</pallas_src>

<mosaic_0001>
module attributes {stable_mosaic.version = 11 : i64} {
  func.func @_normalize_kernel(%arg0: i32, %arg1: i32, %arg2: memref<1x512xf32, #tpu.memory_space<vmem>>, %arg3: memref<1x512xf32, #tpu.memory_space<vmem>>, %arg4: memref<2x512xf32, #tpu.memory_space<vmem>>, %arg5: memref<2x512xf32, #tpu.memory_space<vmem>>) attributes {dimension_semantics = [#tpu.dimension_semantics<parallel>, #tpu.dimension_semantics<parallel>], iteration_bounds = array<i64: 1, 2>, scalar_prefetch = 0 : i64, scratch_operands = 0 : i64, tpu.core_type = #tpu.core_type<tc>, window_params = [{transform_indices = @transform_0, window_bounds = array<i64: 1, 512>}, {transform_indices = @transform_1, window_bounds = array<i64: 1, 512>}, {transform_indices = @transform_2, window_bounds = array<i64: 2, 512>}, {transform_indices = @transform_3, window_bounds = array<i64: 2, 512>}]} {
    %c0 = arith.constant 0 : index
    %c0_0 = arith.constant 0 : index
    %0 = vector.load %arg4[%c0, %c0_0] : memref<2x512xf32, #tpu.memory_space<vmem>>, vector<2x512xf32>
    %c0_1 = arith.constant 0 : index
    %c0_2 = arith.constant 0 : index
    %1 = vector.load %arg2[%c0_1, %c0_2] : memref<1x512xf32, #tpu.memory_space<vmem>>, vector<1x512xf32>
    %2 = vector.broadcast %1 : vector<1x512xf32> to vector<2x512xf32>
    %3 = arith.mulf %0, %2 : vector<2x512xf32>
    %c0_3 = arith.constant 0 : index
    %c0_4 = arith.constant 0 : index
    %4 = vector.load %arg3[%c0_3, %c0_4] : memref<1x512xf32, #tpu.memory_space<vmem>>, vector<1x512xf32>
    %5 = vector.broadcast %4 : vector<1x512xf32> to vector<2x512xf32>
    %6 = arith.addf %3, %5 : vector<2x512xf32>
    %c0_5 = arith.constant 0 : index
    %c0_6 = arith.constant 0 : index
    %7 = vector.load %arg5[%c0_5, %c0_6] : memref<2x512xf32, #tpu.memory_space<vmem>>, vector<2x512xf32>
    tpu.vector_store %arg5[%c0_5, %c0_6], %6 {strides = array<i32>} : memref<2x512xf32, #tpu.memory_space<vmem>>, vector<2x512xf32>,
    return
  }
  func.func @transform_0(%arg0: i32, %arg1: i32) -> (i32, i32) {
    %c0_i32 = arith.constant 0 : i32
    %c0_i32_0 = arith.constant 0 : i32
    return %c0_i32, %arg1 : i32, i32
  }
  func.func @transform_1(%arg0: i32, %arg1: i32) -> (i32, i32) {
    %c0_i32 = arith.constant 0 : i32
    %c0_i32_0 = arith.constant 0 : i32
    return %c0_i32, %arg1 : i32, i32
  }
  func.func @transform_2(%arg0: i32, %arg1: i32) -> (i32, i32) {
    %c0_i32 = arith.constant 0 : i32
    return %arg0, %arg1 : i32, i32
  }
  func.func @transform_3(%arg0: i32, %arg1: i32) -> (i32, i32) {
    %c0_i32 = arith.constant 0 : i32
    return %arg0, %arg1 : i32, i32
  }
}

</mosaic_0001>

<bundles_post_ra>
// kernel: tpu_custom_call.1
= control target key start
LH: loop header
LB: loop body
LE: loop exit
PB: predicated region body
PF: predicated region fallthrough
CT: control target
= control target key end

     0   :  { %s918_s0 = inlined_call_operand.hbm [shape: f32[1,1024], index: 0, kind: input, shape index: {}]   ;;  %s919_s1 = inlined_call_operand.hbm [shape: f32[1,1024], index: 1, kind: input, shape index: {}]   ;;  %s920_s2 = inlined_call_operand.hbm [shape: f32[2,1024], index: 2, kind: input, shape index: {}]   ;;  %s921_s3 = inlined_call_operand.hbm [shape: f32[2,1024], index: 3, kind: output, shape index: {}]  }
   0x1   :  { %927 = sst [smem:[#allocation17_spill]] %s919_s1 }
   0x2   :  { %8 = vsyncpa [#allocation3], 0 }
   0x3   :  { %10 = vsyncpa [#allocation3 + $0x1], 0 }
   0x4   :  { %11 = vsyncpa [#allocation6], 0 }
   0x5   :  { %13 = vsyncpa [#allocation6 + $0x1], 0 }
   0x6   :  { %14 = vsyncpa [#allocation4], 0 }
   0x7   :  { %16 = vsyncpa [#allocation4 + $0x1], 0  ;;  %s758_s12 = smov 0   ;;  %s760_s13 = smov 0  }
   0x8   :  { %s762_s14 = smov 0   ;;  %s764_s15 = smov 0  }
   0x9   :  { %s766_s16 = smov 0   ;;  %s768_s17 = smov 0  }
   0xa LB: > { %928 = sst [smem:[#allocation12_spill]] %s724_s14  ;;  %s789_s18 = sadd.s32 4294967295, %s736_s17   ;;  %s736_s17 = sphi %s768_s17, %s22_s17   ;;  %s732_s16 = sphi %s766_s16, %s949_s16   ;;  %s728_s15 = sphi %s764_s15, %s948_s15   ;;  %s724_s14 = sphi %s762_s14, %s947_s14   ;;  %s720_s13 = sphi %s760_s13, %s946_s13   ;;  %s716_s12 = sphi %s758_s12, %s945_s12  }
   0xb   : > { %929 = sst [smem:[#allocation13_spill]] %s736_s17  ;;  %s466_s19 = sadd.s32 4294967294, %s736_s17  }
   0xc   : > { %s31_s20 = sadd.s32 1, %s732_s16  ;;  %s41_s21 = sadd.s32 1, %s724_s14 }
   0xd   : > { %p32_p0 = scmp.ge.s32.totalorder %s31_s20, 2  ;;  %p48_p1 = scmp.ne.s32.totalorder %s724_s14, %s720_s13 }
   0xe   : > { %p49_p2 = scmp.eq.s32.totalorder %s736_s17, 0  ;;  %p54_p3 = scmp.ne.s32.totalorder %s720_s13, %s716_s12 }
   0xf   : > { %s951_s20 = smov (%p32_p0, %s31_s20), 0  ;;  %p55_p5 = scmp.eq.s32.totalorder %s789_s18, 0 }
  0x10   : > { %930 = sst [smem:[#allocation14_spill]] %s951_s20  ;;  %p801_p4 = por %p49_p2, %p48_p1 }
  0x11   : > { %s38_s23 = ssub.s32 %s732_s16, %s951_s20  ;;  %p134_p6 = scmp.eq.s32.totalorder %s789_s18, 1 }
  0x12   : > { %p39_p7 = scmp.eq.s32.totalorder %s38_s23, 0  ;;  %p809_p8 = por %p55_p5, %p54_p3 }
  0x13   : > { %p813_p9 = por %p134_p6, %p48_p1  ;;  %p140_p10 = scmp.eq.s32.totalorder %s466_s19, 1 }
  0x14   : > { %s818_s26 = scalar_select %p39_p7, %s724_s14, %s41_s21  }
  0x15   : > { %p820_p11 = por %p140_p10, %p54_p3  ;;  %p468_p12 = scmp.ge.s32.totalorder %s736_s17, 2 }
  0x16   : > { %934 = sst [smem:[#allocation15_spill]] %s818_s26  ;;  %p510_p13 = scmp.lt.s32.totalorder %s736_s17, 2 }
  0x17   : > { %s935_s27 = scalar_select %p820_p11, 1, 0 }
  0x18   : > { %s160_s28 = sand.u32 1, %s724_s14   ;;  %s470_s30 = sshll.u32 %s732_s16, 2 }
  0x19   : > { %936 = sst [smem:[#allocation16_spill]] %s935_s27  ;;  %s469_s29 = sshll.u32 %s160_s28, 2 }
  0x1a   : > { %p830_p0 = pnand %p510_p13, %p801_p4  ;;  %s179_s5 = sand.u32 1, %s736_s17  }
  0x1b   : > { %s938_s1 = sld [smem:[#allocation17_spill]]  ;;  %s183_s10 = scalar_lea.vmem [#allocation5], %s469_s29 }
  0x1c   : > { %s191_s11 = sshll.u32 %s183_s10, 4  ;;  %s180_s19 = scalar_lea.sflag [#allocation6], %s179_s5  ;;  %s192_s11 = int_to_ptr.vmem [resolvable:$true] %s191_s11 }
  0x1d   : > { %p476_p1 = scmp.ge.s32.totalorder %s736_s17, 1  ;;  %p218_p2 = scmp.lt.s32.totalorder %s736_s17, 3 }
  0x1e   : > { %s168_s6 = scalar_lea.hbm %s918_s0, %s470_s30  ;;  %s473_s5 = sshll.u32 %s160_s28, 3 }
  0x1f   : > { %p842_p3 = pnand %p476_p1, %p218_p2  ;;  %s170_s7 = sshll.u32 %s168_s6, 4  ;;  %s171_s7 = int_to_ptr.hbm [resolvable:$true] %s170_s7 }
  0x20   : > { %s202_s17 = scalar_lea.vmem [#allocation7], %s473_s5 }
  0x21   : > { %s187_s8 = scalar_lea.hbm %s938_s1, %s470_s30  ;;  %s161_s1 = scalar_lea.sflag [#allocation3], %s160_s28 }
  0x22   : > { %s189_s9 = sshll.u32 %s187_s8, 4  ;;  %s164_s8 = scalar_lea.vmem [#allocation2], %s469_s29  ;;  %s190_s9 = int_to_ptr.hbm [resolvable:$true] %s189_s9 }
  0x23   : > { %502 = dma.hbm_to_vmem [thread:$0]  (!%p830_p0), %s190_s9, 64, %s192_s11, %s180_s19  }
  0x24   : > { %s172_s10 = sshll.u32 %s164_s8, 4  ;;  %s486_s9 = sshll.u32 %s732_s16, 3  ;;  %s173_s10 = int_to_ptr.vmem [resolvable:$true] %s172_s10 }
  0x25   : > { %499 = dma.hbm_to_vmem [thread:$0]  (!%p830_p0), %s171_s7, 64, %s173_s10, %s161_s1  }
  0x26   : > { %s209_s26 = scalar_lea.hbm %s920_s2, %s486_s9  ;;  %s213_s27 = sshll.u32 %s202_s17, 4  ;;  %s214_s27 = int_to_ptr.vmem [resolvable:$true] %s213_s27 }
  0x27   : > { %s211_s14 = sshll.u32 %s209_s26, 4  ;;  %222 = sbr.rel (%p842_p3) target bundleno = 65 (0x41), region = 32  ;;  %s212_s14 = int_to_ptr.hbm [resolvable:$true] %s211_s14 }
  0x28   : > { %505 = dma.hbm_to_vmem [thread:$0]  (!%p830_p0), %s212_s14, 128, %s214_s27, %s180_s19  }
  0x29   : > { %s860_s29 = sand.u32 (!%p842_p3), 1, %s720_s13  }
  0x2a   : > { %s477_s1 = sshll.u32 (!%p842_p3), %s860_s29, 2  ;;  %s225_s28 = scalar_lea.sflag (!%p842_p3), [#allocation3], %s860_s29 }
  0x2b   : > { %s228_s20 = scalar_lea.vmem (!%p842_p3), [#allocation2], %s477_s1 }
  0x2c   : > { %703 = dma.done.wait (%p809_p8), %s225_s28, 64  }
  0x2d   : > { %705 = vsyncadd (%p809_p8), %s225_s28, 4294967232  ;;  %s234_s14 = sand.u32 1, %s789_s18   ;;  %s238_s26 = scalar_lea.vmem [#allocation5], %s477_s1 }
  0x2e   : > { %s235_s17 = scalar_lea.sflag [#allocation6], %s234_s14 }
  0x2f   : > { %707 = dma.done.wait (%p809_p8), %s235_s17, 192  }
  0x30   : > { %709 = vsyncadd (%p809_p8), %s235_s17, 4294967104  ;;  %s479_s27 = sshll.u32 %s860_s29, 3  ;;  %vm296_vm0 = vcmask 1041408   ;;  %v287_v0 = vld [vmem:[%s228_s20] sm:$0xf]  ;;  %vm298_vm1 = vcmask 1045508  }
  0x31   : > { %v304_v1 = vld [vmem:[%s238_s26] sm:$0xf]  ;;  %s487_s30 = sshll.u32 %s728_s15, 3  ;;  %v289_v2 = vperm.slane %v287_v0, 0  ;;  %v290_v3 = vperm.slane %v287_v0, 1  ;;  %v291_v4 = vperm.slane %v287_v0, 2 }
  0x32   : > { %v292_v5 = vperm.slane %v287_v0, 3  ;;  %v306_v6 = vperm.slane %v304_v1, 0  ;;  %v307_v7 = vperm.slane %v304_v1, 1  ;;  %v308_v8 = vperm.slane %v304_v1, 2  ;;  %s333_s4 = scalar_lea.hbm %s921_s3, %s487_s30  ;;  %s248_s19 = scalar_lea.vmem [#allocation7], %s479_s27 }
  0x33   : > { %v309_v9 = vperm.slane %v304_v1, 3  ;;  %v293_v10 = vrot.slane %v290_v3, 6  ;;  %v294_v11 = vrot.slane %v291_v4, 4  ;;  %vm300_vm2 = vcmask 1043456   ;;  %v286_v13 = vld [vmem:[%s248_s19] sm:$0xff]  ;;  %s281_s15 = scalar_lea.vmem [#allocation8], %s479_s27 }
  0x34   : > { %v295_v12 = vrot.slane %v292_v5, 2  ;;  %v310_v14 = vrot.slane %v307_v7, 6  ;;  %v311_v15 = vrot.slane %v308_v8, 4  ;;  %s335_s21 = sshll.u32 %s281_s15, 4  ;;  %s337_s22 = sshll.u32 %s333_s4, 4  ;;  %s336_s21 = int_to_ptr.vmem [resolvable:$true] %s335_s21  ;;  %s338_s22 = int_to_ptr.hbm [resolvable:$true] %s337_s22 }
  0x35   : > { %v312_v16 = vrot.slane %v309_v9, 2  ;;  %v297_v17 = vsel %vm296_vm0, %v289_v2, %v293_v10  ;;  %s320_s23 = scalar_lea.sflag [#allocation4], %s860_s29  ;;  %s664_s6 = sshra.s32 %s338_s22, 4  ;;  %s665_s6 = int_to_ptr.hbm [resolvable:$true] %s664_s6 }
  0x36   : > { %v299_v18 = vsel %vm298_vm1, %v294_v11, %v295_v12  ;;  %v313_v20 = vsel %vm296_vm0, %v306_v6, %v310_v14  ;;  %s666_s7 = scalar_lea.hbm %s665_s6, 8  ;;  %s670_s5 = scalar_lea.hbm %s921_s3, 16 }
  0x37   : > { %v301_v19 = vsel %vm300_vm2, %v297_v17, %v299_v18  ;;  %v314_v21 = vsel %vm298_vm1, %v311_v15, %v312_v16  ;;  %p667_p4 = scmp.ne.s32.totalorder %s665_s6, %s666_s7  ;;  %p671_p7 = scmp.lt.s32.totalorder %s665_s6, %s921_s3 }
  0x38   : > { %v303_v22 = vmul.f32 %v301_v19, %v286_v13  ;;  %v315_v23 = vsel %vm300_vm2, %v313_v20, %v314_v21  ;;  %p672_p8 = scmp.lt.s32.totalorder %s670_s5, %s666_s7 }
  0x39   : > { %p668_p5 = pnand %p667_p4, %p813_p9 }
  0x3a   : > { %v317_v24 = vadd.f32 %v315_v23, %v303_v22  ;;  %p673_p10 = por %p672_p8, %p671_p7 }
  0x3b   : > { %p669_p6 = pneg %p668_p5 }
  0x3c   : > { %318 = vst [vmem:[%s281_s15] sm:$0xff] %v317_v24 }
  0x3d   : > { %p674_p13 = pnand %p673_p10, %p669_p6 }
  0x3f   : > { %677 = shalt.err (!%p674_p13)
}
  0x40   : > { %494 = dma.vmem_to_hbm [thread:$0]  (%p813_p9), %s336_s21, 128, %s338_s22, %s320_s23  }
  0x41 PF: > { %s941_s1 = sld [smem:[#allocation13_spill]]  ;;  %s349_s28 = sand.u32 1, %s716_s12  }
  0x42   : > { %p507_p0 = pnand %p468_p12, %p820_p11  ;;  %s350_s20 = scalar_lea.sflag [#allocation4], %s349_s28 }
  0x44   : > { %p508_p1 = pneg %p507_p0 }
  0x46   : > { %711 = dma.done.wait (%p508_p1), %s350_s20, 128  }
  0x47   : > { %713 = vsyncadd (%p508_p1), %s350_s20, 4294967168  ;;  %s22_s17 = sadd.s32 1, %s941_s1   ;;  %s942_s14 = sld [smem:[#allocation12_spill]] }
  0x48   : > { %p19_p2 = scmp.ge.s32.totalorder %s22_s17, 4   ;;  %s943_s26 = sld [smem:[#allocation15_spill]] }
  0x49   : > { %s944_s25 = sld [smem:[#allocation14_spill]]  ;;  %s945_s12 = smov %s720_s13 }
  0x4a   : > { %s948_s15 = smov %s732_s16 }
  0x4b   :  { %21 = sbr.rel (!%p19_p2) target bundleno = 10 (0xa), region = 101 }
  0x4d   : > { %s946_s13 = smov %s942_s14 }
  0x4e   : > { %s947_s14 = smov %s943_s26 }
  0x4f   : > { %s949_s16 = smov %s944_s25 }
  0x50   :  { %356 = vsyncpa [#allocation3], 1 }
  0x51   :  { %358 = vsyncpa [#allocation3 + $0x1], 1 }
  0x52   :  { %359 = vsyncpa [#allocation6], 1 }
  0x53   :  { %361 = vsyncpa [#allocation6 + $0x1], 1 }
  0x54   :  { %362 = vsyncpa [#allocation4], 1 }
  0x55   :  { %364 = vsyncpa [#allocation4 + $0x1], 1 }

</bundles_post_ra>
